<compile_context>
chip_gen: v5e
topology: v5e:2x2
jax: 0.10.0
libtpu: 0.0.40
codegen_flags: <defaults>
</compile_context>

<pallas_src>
import functools

import jax
import jax.numpy as jnp
from jax import lax
from jax.experimental import pallas as pl
from jax.experimental.pallas import tpu as pltpu


def _local_shmax_kernel(x_ref, w_ref, o_ref, *, band_indices, fh, fw):
    # x_ref: (bn, C, H, W)            bf16 -- raw input rows, DMA'd straight from x
    # w_ref: (n_bands, C, fw*K, fh)   bf16 -- per-(band, channel) stacked shift dicts
    # o_ref: (bn, n_bands, K, W_out)  f32  -- band-major layout -> dense (K, W_out) stores
    bn, C, H, W = x_ref.shape
    n_bands = o_ref.shape[1]
    K = o_ref.shape[2]
    w_out = o_ref.shape[3]

    for nb in range(bn):                                    # static: batch elems / step
        accs = [jnp.zeros((K, w_out), jnp.float32) for _ in range(n_bands)]
        for c in range(C):                                  # static: channels
            xc = x_ref[nb, c]                               # (H, W) aligned dense load
            for b in range(n_bands):                        # static: bands
                bi = band_indices[b]
                xb = xc[bi:bi + fh, :]                      # (fh, W) value slice (static)
                # One MXU push per (channel, band): fw dictionaries stacked along M,
                # dotted against the UNshifted full-width rows; combine the K-row
                # groups with lane-shifted adds (cheap VPU, no RHS relayout).
                res = jnp.dot(w_ref[b, c], xb,
                              preferred_element_type=jnp.float32)   # (fw*K, W) f32
                acc = accs[b]
                for dw in range(fw):
                    acc = acc + res[dw * K:(dw + 1) * K, dw:dw + w_out]
                accs[b] = acc
        for b in range(n_bands):
            o_ref[nb, b] = accs[b]                          # dense (K, W_out) store


def local_shmax_forward(x, weights, band_indices, *, batch_block=1):
    """x: (N, C_in, H, W) float32.
    weights: (n_bands, dict_size, C_in, fh, fw) float32 (one dict_tensor per band).
    Returns: (N, dict_size, n_bands, W - fw + 1) float32."""
    n_bands, K, C, fh, fw = weights.shape
    N, Cx, H, W = x.shape
    assert Cx == C
    W_out = W - fw + 1
    bn = int(batch_block)
    assert N % bn == 0, "batch_block must divide N"
    band_indices = tuple(int(b) for b in band_indices)
    assert all(0 <= bi and bi + fh <= H for bi in band_indices)

    # bf16 operands, f32 accumulation: halves HBM reads / VMEM; MXU is bf16-native.
    # (In a real pipeline x would already arrive in bf16; the cast is done here
    #  only because this script starts from f32 inputs.)
    x_bf = x.astype(jnp.bfloat16)
    # (n_bands, K, C, fh, fw) -> (n_bands, C, fw, K, fh) -> (n_bands, C, fw*K, fh):
    # row dw*K + k of w_fused[b, c] is weights[b, k, c, :, dw].
    w_fused = jnp.transpose(weights, (0, 2, 4, 1, 3)).reshape(n_bands, C, fw * K, fh)
    w_bf = w_fused.astype(jnp.bfloat16)

    flops = 2 * N * n_bands * C * (fw * K) * fh * W
    bytes_accessed = (2 * N * C * H * W            # x read once (bf16)
                      + 2 * n_bands * C * fw * K * fh   # resident dicts (bf16)
                      + 4 * N * n_bands * K * W_out)    # f32 output write
    cost = pl.CostEstimate(flops=flops, transcendentals=0,
                           bytes_accessed=bytes_accessed)

    kernel = functools.partial(_local_shmax_kernel,
                               band_indices=band_indices, fh=fh, fw=fw)

    out_bkw = pl.pallas_call(
        kernel,
        out_shape=jax.ShapeDtypeStruct((N, n_bands, K, W_out), jnp.float32),
        grid=(N // bn,),
        in_specs=[
            # Raw input rows for this batch block; last two block dims = full (H, W).
            pl.BlockSpec((bn, C, H, W), lambda n: (n, 0, 0, 0)),
            # Full dictionary block; index_map ignores n -> stays VMEM-resident.
            pl.BlockSpec((n_bands, C, fw * K, fh), lambda n: (0, 0, 0, 0)),
        ],
        # Band-major output so every per-band store is a dense (K, W_out) tile.
        out_specs=pl.BlockSpec((bn, n_bands, K, W_out), lambda n: (n, 0, 0, 0)),
        compiler_params=pltpu.CompilerParams(
            dimension_semantics=("parallel",)),
        cost_estimate=cost,
    )(x_bf, w_bf)

    # Tiny final transpose of the small output to the PyTorch layout.
    return jnp.transpose(out_bkw, (0, 2, 1, 3))


def _reference_forward(x, weights, band_indices):
    """Pure-JAX reference mirroring the PyTorch module (lax conv per band)."""
    n_bands, K, C, fh, fw = weights.shape
    outs = []
    for i, bi in enumerate(band_indices):
        xs = x[:, :, bi:bi + fh, :]
        o = lax.conv_general_dilated(
            xs, weights[i], window_strides=(1, 1), padding="VALID",
            dimension_numbers=("NCHW", "OIHW", "NCHW"),
            precision=lax.Precision.HIGHEST)
        outs.append(o)                                     # (N, K, 1, W_out)
    return jnp.concatenate(outs, axis=-2)                  # (N, K, n_bands, W_out)


if __name__ == "__main__":
    # Module config (synthetic, deterministic): filters_shape=(3,3), dict_size=8,
    # channels_in=4, n_bands=4 -> band_indices = [0, 3, 6, 9].
    filters_shape = (3, 3)
    dict_size = 8
    channels_in = 4
    n_bands = 4
    band_indices = [i * filters_shape[0] for i in range(n_bands)]

    N, H, W = 2, 16, 16
    key = jax.random.PRNGKey(0)
    kx, kw = jax.random.split(key)
    x = jax.random.normal(kx, (N, channels_in, H, W), dtype=jnp.float32)
    # One dict_tensor per band: (dict_size, channels_in, fh, fw)
    weights = jax.random.normal(
        kw, (n_bands, dict_size, channels_in, *filters_shape), dtype=jnp.float32)

    out = local_shmax_forward(x, weights, band_indices, batch_block=1)
    out = jax.block_until_ready(out)

    # Reference on the same bf16-rounded operands (kernel uses bf16 inputs,
    # f32 accumulation), so only accumulation-order noise remains.
    x_r = x.astype(jnp.bfloat16).astype(jnp.float32)
    w_r = weights.astype(jnp.bfloat16).astype(jnp.float32)
    ref = _reference_forward(x_r, w_r, band_indices)

    W_out = W - filters_shape[1] + 1
    assert out.shape == (N, dict_size, n_bands, W_out), out.shape
    assert jnp.allclose(out, ref, atol=2e-3, rtol=2e-3), "mismatch vs conv reference"

    print("KERNEL_OK")
</pallas_src>

<mosaic_0001>
module attributes {stable_mosaic.version = 11 : i64} {
  func.func @_local_shmax_kernel(%arg0: i32, %arg1: memref<1x4x16x16xbf16, #tpu.memory_space<vmem>>, %arg2: memref<4x4x24x3xbf16, #tpu.memory_space<vmem>>, %arg3: memref<1x4x8x14xf32, #tpu.memory_space<vmem>>) attributes {dimension_semantics = [#tpu.dimension_semantics<parallel>], iteration_bounds = array<i64: 2>, scalar_prefetch = 0 : i64, scratch_operands = 0 : i64, tpu.core_type = #tpu.core_type<tc>, window_params = [{transform_indices = @transform_0, window_bounds = array<i64: 1, 4, 16, 16>}, {pipeline_mode = #tpu.pipeline_mode<synchronous>, transform_indices = @transform_1, window_bounds = array<i64: 4, 4, 24, 3>}, {transform_indices = @transform_2, window_bounds = array<i64: 1, 4, 8, 14>}]} {
    %cst = arith.constant 0.000000e+00 : f32
    %0 = vector.broadcast %cst : f32 to vector<8x14xf32>
    %cst_0 = arith.constant 0.000000e+00 : f32
    %1 = vector.broadcast %cst_0 : f32 to vector<8x14xf32>
    %cst_1 = arith.constant 0.000000e+00 : f32
    %2 = vector.broadcast %cst_1 : f32 to vector<8x14xf32>
    %cst_2 = arith.constant 0.000000e+00 : f32
    %3 = vector.broadcast %cst_2 : f32 to vector<8x14xf32>
    %c0 = arith.constant 0 : index
    %c0_3 = arith.constant 0 : index
    %c0_4 = arith.constant 0 : index
    %c0_5 = arith.constant 0 : index
    %4 = vector.load %arg1[%c0, %c0_3, %c0_4, %c0_5] : memref<1x4x16x16xbf16, #tpu.memory_space<vmem>>, vector<1x1x16x16xbf16>
    %5 = vector.shape_cast %4 : vector<1x1x16x16xbf16> to vector<16x16xbf16>
    %6 = vector.extract_strided_slice %5 {offsets = [0, 0], sizes = [3, 16], strides = [1, 1]} : vector<16x16xbf16> to vector<3x16xbf16>
    %c0_6 = arith.constant 0 : index
    %c0_7 = arith.constant 0 : index
    %c0_8 = arith.constant 0 : index
    %c0_9 = arith.constant 0 : index
    %7 = vector.load %arg2[%c0_6, %c0_7, %c0_8, %c0_9] : memref<4x4x24x3xbf16, #tpu.memory_space<vmem>>, vector<1x1x24x3xbf16>
    %8 = vector.shape_cast %7 : vector<1x1x24x3xbf16> to vector<24x3xbf16>
    %cst_10 = arith.constant dense<0.000000e+00> : vector<24x16xf32>
    %9 = tpu.matmul %8, %6, %cst_10 {dimension_numbers = #tpu.dot_dimension_numbers<[1], [0], [0], [1], [0, 0, 1, 1], [], []>} : vector<24x3xbf16>, vector<3x16xbf16>, vector<24x16xf32> -> vector<24x16xf32>
    %10 = vector.extract_strided_slice %9 {offsets = [0, 0], sizes = [8, 14], strides = [1, 1]} : vector<24x16xf32> to vector<8x14xf32>
    %11 = arith.addf %0, %10 : vector<8x14xf32>
    %12 = vector.extract_strided_slice %9 {offsets = [8, 1], sizes = [8, 14], strides = [1, 1]} : vector<24x16xf32> to vector<8x14xf32>
    %13 = arith.addf %11, %12 : vector<8x14xf32>
    %14 = vector.extract_strided_slice %9 {offsets = [16, 2], sizes = [8, 14], strides = [1, 1]} : vector<24x16xf32> to vector<8x14xf32>
    %15 = arith.addf %13, %14 : vector<8x14xf32>
    %16 = vector.extract_strided_slice %5 {offsets = [3, 0], sizes = [3, 16], strides = [1, 1]} : vector<16x16xbf16> to vector<3x16xbf16>
    %c1 = arith.constant 1 : index
    %c0_11 = arith.constant 0 : index
    %c0_12 = arith.constant 0 : index
    %c0_13 = arith.constant 0 : index
    %17 = vector.load %arg2[%c1, %c0_11, %c0_12, %c0_13] : memref<4x4x24x3xbf16, #tpu.memory_space<vmem>>, vector<1x1x24x3xbf16>
    %18 = vector.shape_cast %17 : vector<1x1x24x3xbf16> to vector<24x3xbf16>
    %cst_14 = arith.constant dense<0.000000e+00> : vector<24x16xf32>
    %19 = tpu.matmul %18, %16, %cst_14 {dimension_numbers = #tpu.dot_dimension_numbers<[1], [0], [0], [1], [0, 0, 1, 1], [], []>} : vector<24x3xbf16>, vector<3x16xbf16>, vector<24x16xf32> -> vector<24x16xf32>
    %20 = vector.extract_strided_slice %19 {offsets = [0, 0], sizes = [8, 14], strides = [1, 1]} : vector<24x16xf32> to vector<8x14xf32>
    %21 = arith.addf %1, %20 : vector<8x14xf32>
    %22 = vector.extract_strided_slice %19 {offsets = [8, 1], sizes = [8, 14], strides = [1, 1]} : vector<24x16xf32> to vector<8x14xf32>
    %23 = arith.addf %21, %22 : vector<8x14xf32>
    %24 = vector.extract_strided_slice %19 {offsets = [16, 2], sizes = [8, 14], strides = [1, 1]} : vector<24x16xf32> to vector<8x14xf32>
    %25 = arith.addf %23, %24 : vector<8x14xf32>
    %26 = vector.extract_strided_slice %5 {offsets = [6, 0], sizes = [3, 16], strides = [1, 1]} : vector<16x16xbf16> to vector<3x16xbf16>
    %c2 = arith.constant 2 : index
    %c0_15 = arith.constant 0 : index
    %c0_16 = arith.constant 0 : index
    %c0_17 = arith.constant 0 : index
    %27 = vector.load %arg2[%c2, %c0_15, %c0_16, %c0_17] : memref<4x4x24x3xbf16, #tpu.memory_space<vmem>>, vector<1x1x24x3xbf16>
    %28 = vector.shape_cast %27 : vector<1x1x24x3xbf16> to vector<24x3xbf16>
    %cst_18 = arith.constant dense<0.000000e+00> : vector<24x16xf32>
    %29 = tpu.matmul %28, %26, %cst_18 {dimension_numbers = #tpu.dot_dimension_numbers<[1], [0], [0], [1], [0, 0, 1, 1], [], []>} : vector<24x3xbf16>, vector<3x16xbf16>, vector<24x16xf32> -> vector<24x16xf32>
    %30 = vector.extract_strided_slice %29 {offsets = [0, 0], sizes = [8, 14], strides = [1, 1]} : vector<24x16xf32> to vector<8x14xf32>
    %31 = arith.addf %2, %30 : vector<8x14xf32>
    %32 = vector.extract_strided_slice %29 {offsets = [8, 1], sizes = [8, 14], strides = [1, 1]} : vector<24x16xf32> to vector<8x14xf32>
    %33 = arith.addf %31, %32 : vector<8x14xf32>
    %34 = vector.extract_strided_slice %29 {offsets = [16, 2], sizes = [8, 14], strides = [1, 1]} : vector<24x16xf32> to vector<8x14xf32>
    %35 = arith.addf %33, %34 : vector<8x14xf32>
    %36 = vector.extract_strided_slice %5 {offsets = [9, 0], sizes = [3, 16], strides = [1, 1]} : vector<16x16xbf16> to vector<3x16xbf16>
    %c3 = arith.constant 3 : index
    %c0_19 = arith.constant 0 : index
    %c0_20 = arith.constant 0 : index
    %c0_21 = arith.constant 0 : index
    %37 = vector.load %arg2[%c3, %c0_19, %c0_20, %c0_21] : memref<4x4x24x3xbf16, #tpu.memory_space<vmem>>, vector<1x1x24x3xbf16>
    %38 = vector.shape_cast %37 : vector<1x1x24x3xbf16> to vector<24x3xbf16>
    %cst_22 = arith.constant dense<0.000000e+00> : vector<24x16xf32>
    %39 = tpu.matmul %38, %36, %cst_22 {dimension_numbers = #tpu.dot_dimension_numbers<[1], [0], [0], [1], [0, 0, 1, 1], [], []>} : vector<24x3xbf16>, vector<3x16xbf16>, vector<24x16xf32> -> vector<24x16xf32>
    %40 = vector.extract_strided_slice %39 {offsets = [0, 0], sizes = [8, 14], strides = [1, 1]} : vector<24x16xf32> to vector<8x14xf32>
    %41 = arith.addf %3, %40 : vector<8x14xf32>
    %42 = vector.extract_strided_slice %39 {offsets = [8, 1], sizes = [8, 14], strides = [1, 1]} : vector<24x16xf32> to vector<8x14xf32>
    %43 = arith.addf %41, %42 : vector<8x14xf32>
    %44 = vector.extract_strided_slice %39 {offsets = [16, 2], sizes = [8, 14], strides = [1, 1]} : vector<24x16xf32> to vector<8x14xf32>
    %45 = arith.addf %43, %44 : vector<8x14xf32>
    %c0_23 = arith.constant 0 : index
    %c1_24 = arith.constant 1 : index
    %c0_25 = arith.constant 0 : index
    %c0_26 = arith.constant 0 : index
    %46 = vector.load %arg1[%c0_23, %c1_24, %c0_25, %c0_26] : memref<1x4x16x16xbf16, #tpu.memory_space<vmem>>, vector<1x1x16x16xbf16>
    %47 = vector.shape_cast %46 : vector<1x1x16x16xbf16> to vector<16x16xbf16>
    %48 = vector.extract_strided_slice %47 {offsets = [0, 0], sizes = [3, 16], strides = [1, 1]} : vector<16x16xbf16> to vector<3x16xbf16>
    %c0_27 = arith.constant 0 : index
    %c1_28 = arith.constant 1 : index
    %c0_29 = arith.constant 0 : index
    %c0_30 = arith.constant 0 : index
    %49 = vector.load %arg2[%c0_27, %c1_28, %c0_29, %c0_30] : memref<4x4x24x3xbf16, #tpu.memory_space<vmem>>, vector<1x1x24x3xbf16>
    %50 = vector.shape_cast %49 : vector<1x1x24x3xbf16> to vector<24x3xbf16>
    %cst_31 = arith.constant dense<0.000000e+00> : vector<24x16xf32>
    %51 = tpu.matmul %50, %48, %cst_31 {dimension_numbers = #tpu.dot_dimension_numbers<[1], [0], [0], [1], [0, 0, 1, 1], [], []>} : vector<24x3xbf16>, vector<3x16xbf16>, vector<24x16xf32> -> vector<24x16xf32>
    %52 = vector.extract_strided_slice %51 {offsets = [0, 0], sizes = [8, 14], strides = [1, 1]} : vector<24x16xf32> to vector<8x14xf32>
    %53 = arith.addf %15, %52 : vector<8x14xf32>
    %54 = vector.extract_strided_slice %51 {offsets = [8, 1], sizes = [8, 14], strides = [1, 1]} : vector<24x16xf32> to vector<8x14xf32>
    %55 = arith.addf %53, %54 : vector<8x14xf32>
    %56 = vector.extract_strided_slice %51 {offsets = [16, 2], sizes = [8, 14], strides = [1, 1]} : vector<24x16xf32> to vector<8x14xf32>
    %57 = arith.addf %55, %56 : vector<8x14xf32>
    %58 = vector.extract_strided_slice %47 {offsets = [3, 0], sizes = [3, 16], strides = [1, 1]} : vector<16x16xbf16> to vector<3x16xbf16>
    %c1_32 = arith.constant 1 : index
    %c1_33 = arith.constant 1 : index
    %c0_34 = arith.constant 0 : index
    %c0_35 = arith.constant 0 : index
    %59 = vector.load %arg2[%c1_32, %c1_33, %c0_34, %c0_35] : memref<4x4x24x3xbf16, #tpu.memory_space<vmem>>, vector<1x1x24x3xbf16>
    %60 = vector.shape_cast %59 : vector<1x1x24x3xbf16> to vector<24x3xbf16>
    %cst_36 = arith.constant dense<0.000000e+00> : vector<24x16xf32>
    %61 = tpu.matmul %60, %58, %cst_36 {dimension_numbers = #tpu.dot_dimension_numbers<[1], [0], [0], [1], [0, 0, 1, 1], [], []>} : vector<24x3xbf16>, vector<3x16xbf16>, vector<24x16xf32> -> vector<24x16xf32>
    %62 = vector.extract_strided_slice %61 {offsets = [0, 0], sizes = [8, 14], strides = [1, 1]} : vector<24x16xf32> to vector<8x14xf32>
    %63 = arith.addf %25, %62 : vector<8x14xf32>
    %64 = vector.extract_strided_slice %61 {offsets = [8, 1], sizes = [8, 14], strides = [1, 1]} : vector<24x16xf32> to vector<8x14xf32>
    %65 = arith.addf %63, %64 : vector<8x14xf32>
    %66 = vector.extract_strided_slice %61 {offsets = [16, 2], sizes = [8, 14], strides = [1, 1]} : vector<24x16xf32> to vector<8x14xf32>
    %67 = arith.addf %65, %66 : vector<8x14xf32>
    %68 = vector.extract_strided_slice %47 {offsets = [6, 0], sizes = [3, 16], strides = [1, 1]} : vector<16x16xbf16> to vector<3x16xbf16>
    %c2_37 = arith.constant 2 : index
    %c1_38 = arith.constant 1 : index
    %c0_39 = arith.constant 0 : index
    %c0_40 = arith.constant 0 : index
    %69 = vector.load %arg2[%c2_37, %c1_38, %c0_39, %c0_40] : memref<4x4x24x3xbf16, #tpu.memory_space<vmem>>, vector<1x1x24x3xbf16>
    %70 = vector.shape_cast %69 : vector<1x1x24x3xbf16> to vector<24x3xbf16>
    %cst_41 = arith.constant dense<0.000000e+00> : vector<24x16xf32>
    %71 = tpu.matmul %70, %68, %cst_41 {dimension_numbers = #tpu.dot_dimension_numbers<[1], [0], [0], [1], [0, 0, 1, 1], [], []>} : vector<24x3xbf16>, vector<3x16xbf16>, vector<24x16xf32> -> vector<24x16xf32>
    %72 = vector.extract_strided_slice %71 {offsets = [0, 0], sizes = [8, 14], strides = [1, 1]} : vector<24x16xf32> to vector<8x14xf32>
    %73 = arith.addf %35, %72 : vector<8x14xf32>
    %74 = vector.extract_strided_slice %71 {offsets = [8, 1], sizes = [8, 14], strides = [1, 1]} : vector<24x16xf32> to vector<8x14xf32>
    %75 = arith.addf %73, %74 : vector<8x14xf32>
    %76 = vector.extract_strided_slice %71 {offsets = [16, 2], sizes = [8, 14], strides = [1, 1]} : vector<24x16xf32> to vector<8x14xf32>
    %77 = arith.addf %75, %76 : vector<8x14xf32>
    %78 = vector.extract_strided_slice %47 {offsets = [9, 0], sizes = [3, 16], strides = [1, 1]} : vector<16x16xbf16> to vector<3x16xbf16>
    %c3_42 = arith.constant 3 : index
    %c1_43 = arith.constant 1 : index
    %c0_44 = arith.constant 0 : index
    %c0_45 = arith.constant 0 : index
    %79 = vector.load %arg2[%c3_42, %c1_43, %c0_44, %c0_45] : memref<4x4x24x3xbf16, #tpu.memory_space<vmem>>, vector<1x1x24x3xbf16>
    %80 = vector.shape_cast %79 : vector<1x1x24x3xbf16> to vector<24x3xbf16>
    %cst_46 = arith.constant dense<0.000000e+00> : vector<24x16xf32>
    %81 = tpu.matmul %80, %78, %cst_46 {dimension_numbers = #tpu.dot_dimension_numbers<[1], [0], [0], [1], [0, 0, 1, 1], [], []>} : vector<24x3xbf16>, vector<3x16xbf16>, vector<24x16xf32> -> vector<24x16xf32>
    %82 = vector.extract_strided_slice %81 {offsets = [0, 0], sizes = [8, 14], strides = [1, 1]} : vector<24x16xf32> to vector<8x14xf32>
    %83 = arith.addf %45, %82 : vector<8x14xf32>
    %84 = vector.extract_strided_slice %81 {offsets = [8, 1], sizes = [8, 14], strides = [1, 1]} : vector<24x16xf32> to vector<8x14xf32>
    %85 = arith.addf %83, %84 : vector<8x14xf32>
    %86 = vector.extract_strided_slice %81 {offsets = [16, 2], sizes = [8, 14], strides = [1, 1]} : vector<24x16xf32> to vector<8x14xf32>
    %87 = arith.addf %85, %86 : vector<8x14xf32>
    %c0_47 = arith.constant 0 : index
    %c2_48 = arith.constant 2 : index
    %c0_49 = arith.constant 0 : index
    %c0_50 = arith.constant 0 : index
    %88 = vector.load %arg1[%c0_47, %c2_48, %c0_49, %c0_50] : memref<1x4x16x16xbf16, #tpu.memory_space<vmem>>, vector<1x1x16x16xbf16>
    %89 = vector.shape_cast %88 : vector<1x1x16x16xbf16> to vector<16x16xbf16>
    %90 = vector.extract_strided_slice %89 {offsets = [0, 0], sizes = [3, 16], strides = [1, 1]} : vector<16x16xbf16> to vector<3x16xbf16>
    %c0_51 = arith.constant 0 : index
    %c2_52 = arith.constant 2 : index
    %c0_53 = arith.constant 0 : index
    %c0_54 = arith.constant 0 : index
    %91 = vector.load %arg2[%c0_51, %c2_52, %c0_53, %c0_54] : memref<4x4x24x3xbf16, #tpu.memory_space<vmem>>, vector<1x1x24x3xbf16>
    %92 = vector.shape_cast %91 : vector<1x1x24x3xbf16> to vector<24x3xbf16>
    %cst_55 = arith.constant dense<0.000000e+00> : vector<24x16xf32>
    %93 = tpu.matmul %92, %90, %cst_55 {dimension_numbers = #tpu.dot_dimension_numbers<[1], [0], [0], [1], [0, 0, 1, 1], [], []>} : vector<24x3xbf16>, vector<3x16xbf16>, vector<24x16xf32> -> vector<24x16xf32>
    %94 = vector.extract_strided_slice %93 {offsets = [0, 0], sizes = [8, 14], strides = [1, 1]} : vector<24x16xf32> to vector<8x14xf32>
    %95 = arith.addf %57, %94 : vector<8x14xf32>
    %96 = vector.extract_strided_slice %93 {offsets = [8, 1], sizes = [8, 14], strides = [1, 1]} : vector<24x16xf32> to vector<8x14xf32>
    %97 = arith.addf %95, %96 : vector<8x14xf32>
    %98 = vector.extract_strided_slice %93 {offsets = [16, 2], sizes = [8, 14], strides = [1, 1]} : vector<24x16xf32> to vector<8x14xf32>
    %99 = arith.addf %97, %98 : vector<8x14xf32>
    %100 = vector.extract_strided_slice %89 {offsets = [3, 0], sizes = [3, 16], strides = [1, 1]} : vector<16x16xbf16> to vector<3x16xbf16>
    %c1_56 = arith.constant 1 : index
    %c2_57 = arith.constant 2 : index
    %c0_58 = arith.constant 0 : index
    %c0_59 = arith.constant 0 : index
    %101 = vector.load %arg2[%c1_56, %c2_57, %c0_58, %c0_59] : memref<4x4x24x3xbf16, #tpu.memory_space<vmem>>, vector<1x1x24x3xbf16>
    %102 = vector.shape_cast %101 : vector<1x1x24x3xbf16> to vector<24x3xbf16>
    %cst_60 = arith.constant dense<0.000000e+00> : vector<24x16xf32>
    %103 = tpu.matmul %102, %100, %cst_60 {dimension_numbers = #tpu.dot_dimension_numbers<[1], [0], [0], [1], [0, 0, 1, 1], [], []>} : vector<24x3xbf16>, vector<3x16xbf16>, vector<24x16xf32> -> vector<24x16xf32>
    %104 = vector.extract_strided_slice %103 {offsets = [0, 0], sizes = [8, 14], strides = [1, 1]} : vector<24x16xf32> to vector<8x14xf32>
    %105 = arith.addf %67, %104 : vector<8x14xf32>
    %106 = vector.extract_strided_slice %103 {offsets = [8, 1], sizes = [8, 14], strides = [1, 1]} : vector<24x16xf32> to vector<8x14xf32>
    %107 = arith.addf %105, %106 : vector<8x14xf32>
    %108 = vector.extract_strided_slice %103 {offsets = [16, 2], sizes = [8, 14], strides = [1, 1]} : vector<24x16xf32> to vector<8x14xf32>
    %109 = arith.addf %107, %108 : vector<8x14xf32>
    %110 = vector.extract_strided_slice %89 {offsets = [6, 0], sizes = [3, 16], strides = [1, 1]} : vector<16x16xbf16> to vector<3x16xbf16>
    %c2_61 = arith.constant 2 : index
    %c2_62 = arith.constant 2 : index
    %c0_63 = arith.constant 0 : index
    %c0_64 = arith.constant 0 : index
    %111 = vector.load %arg2[%c2_61, %c2_62, %c0_63, %c0_64] : memref<4x4x24x3xbf16, #tpu.memory_space<vmem>>, vector<1x1x24x3xbf16>
    %112 = vector.shape_cast %111 : vector<1x1x24x3xbf16> to vector<24x3xbf16>
    %cst_65 = arith.constant dense<0.000000e+00> : vector<24x16xf32>
    %113 = tpu.matmul %112, %110, %cst_65 {dimension_numbers = #tpu.dot_dimension_numbers<[1], [0], [0], [1], [0, 0, 1, 1], [], []>} : vector<24x3xbf16>, vector<3x16xbf16>, vector<24x16xf32> -> vector<24x16xf32>
    %114 = vector.extract_strided_slice %113 {offsets = [0, 0], sizes = [8, 14], strides = [1, 1]} : vector<24x16xf32> to vector<8x14xf32>
    %115 = arith.addf %77, %114 : vector<8x14xf32>
    %116 = vector.extract_strided_slice %113 {offsets = [8, 1], sizes = [8, 14], strides = [1, 1]} : vector<24x16xf32> to vector<8x14xf32>
    %117 = arith.addf %115, %116 : vector<8x14xf32>
    %118 = vector.extract_strided_slice %113 {offsets = [16, 2], sizes = [8, 14], strides = [1, 1]} : vector<24x16xf32> to vector<8x14xf32>
    %119 = arith.addf %117, %118 : vector<8x14xf32>
    %120 = vector.extract_strided_slice %89 {offsets = [9, 0], sizes = [3, 16], strides = [1, 1]} : vector<16x16xbf16> to vector<3x16xbf16>
    %c3_66 = arith.constant 3 : index
    %c2_67 = arith.constant 2 : index
    %c0_68 = arith.constant 0 : index
    %c0_69 = arith.constant 0 : index
    %121 = vector.load %arg2[%c3_66, %c2_67, %c0_68, %c0_69] : memref<4x4x24x3xbf16, #tpu.memory_space<vmem>>, vector<1x1x24x3xbf16>
    %122 = vector.shape_cast %121 : vector<1x1x24x3xbf16> to vector<24x3xbf16>
    %cst_70 = arith.constant dense<0.000000e+00> : vector<24x16xf32>
    %123 = tpu.matmul %122, %120, %cst_70 {dimension_numbers = #tpu.dot_dimension_numbers<[1], [0], [0], [1], [0, 0, 1, 1], [], []>} : vector<24x3xbf16>, vector<3x16xbf16>, vector<24x16xf32> -> vector<24x16xf32>
    %124 = vector.extract_strided_slice %123 {offsets = [0, 0], sizes = [8, 14], strides = [1, 1]} : vector<24x16xf32> to vector<8x14xf32>
    %125 = arith.addf %87, %124 : vector<8x14xf32>
    %126 = vector.extract_strided_slice %123 {offsets = [8, 1], sizes = [8, 14], strides = [1, 1]} : vector<24x16xf32> to vector<8x14xf32>
    %127 = arith.addf %125, %126 : vector<8x14xf32>
    %128 = vector.extract_strided_slice %123 {offsets = [16, 2], sizes = [8, 14], strides = [1, 1]} : vector<24x16xf32> to vector<8x14xf32>
    %129 = arith.addf %127, %128 : vector<8x14xf32>
    %c0_71 = arith.constant 0 : index
    %c3_72 = arith.constant 3 : index
    %c0_73 = arith.constant 0 : index
    %c0_74 = arith.constant 0 : index
    %130 = vector.load %arg1[%c0_71, %c3_72, %c0_73, %c0_74] : memref<1x4x16x16xbf16, #tpu.memory_space<vmem>>, vector<1x1x16x16xbf16>
    %131 = vector.shape_cast %130 : vector<1x1x16x16xbf16> to vector<16x16xbf16>
    %132 = vector.extract_strided_slice %131 {offsets = [0, 0], sizes = [3, 16], strides = [1, 1]} : vector<16x16xbf16> to vector<3x16xbf16>
    %c0_75 = arith.constant 0 : index
    %c3_76 = arith.constant 3 : index
    %c0_77 = arith.constant 0 : index
    %c0_78 = arith.constant 0 : index
    %133 = vector.load %arg2[%c0_75, %c3_76, %c0_77, %c0_78] : memref<4x4x24x3xbf16, #tpu.memory_space<vmem>>, vector<1x1x24x3xbf16>
    %134 = vector.shape_cast %133 : vector<1x1x24x3xbf16> to vector<24x3xbf16>
    %cst_79 = arith.constant dense<0.000000e+00> : vector<24x16xf32>
    %135 = tpu.matmul %134, %132, %cst_79 {dimension_numbers = #tpu.dot_dimension_numbers<[1], [0], [0], [1], [0, 0, 1, 1], [], []>} : vector<24x3xbf16>, vector<3x16xbf16>, vector<24x16xf32> -> vector<24x16xf32>
    %136 = vector.extract_strided_slice %135 {offsets = [0, 0], sizes = [8, 14], strides = [1, 1]} : vector<24x16xf32> to vector<8x14xf32>
    %137 = arith.addf %99, %136 : vector<8x14xf32>
    %138 = vector.extract_strided_slice %135 {offsets = [8, 1], sizes = [8, 14], strides = [1, 1]} : vector<24x16xf32> to vector<8x14xf32>
    %139 = arith.addf %137, %138 : vector<8x14xf32>
    %140 = vector.extract_strided_slice %135 {offsets = [16, 2], sizes = [8, 14], strides = [1, 1]} : vector<24x16xf32> to vector<8x14xf32>
    %141 = arith.addf %139, %140 : vector<8x14xf32>
    %142 = vector.extract_strided_slice %131 {offsets = [3, 0], sizes = [3, 16], strides = [1, 1]} : vector<16x16xbf16> to vector<3x16xbf16>
    %c1_80 = arith.constant 1 : index
    %c3_81 = arith.constant 3 : index
    %c0_82 = arith.constant 0 : index
    %c0_83 = arith.constant 0 : index
    %143 = vector.load %arg2[%c1_80, %c3_81, %c0_82, %c0_83] : memref<4x4x24x3xbf16, #tpu.memory_space<vmem>>, vector<1x1x24x3xbf16>
    %144 = vector.shape_cast %143 : vector<1x1x24x3xbf16> to vector<24x3xbf16>
    %cst_84 = arith.constant dense<0.000000e+00> : vector<24x16xf32>
    %145 = tpu.matmul %144, %142, %cst_84 {dimension_numbers = #tpu.dot_dimension_numbers<[1], [0], [0], [1], [0, 0, 1, 1], [], []>} : vector<24x3xbf16>, vector<3x16xbf16>, vector<24x16xf32> -> vector<24x16xf32>
    %146 = vector.extract_strided_slice %145 {offsets = [0, 0], sizes = [8, 14], strides = [1, 1]} : vector<24x16xf32> to vector<8x14xf32>
    %147 = arith.addf %109, %146 : vector<8x14xf32>
    %148 = vector.extract_strided_slice %145 {offsets = [8, 1], sizes = [8, 14], strides = [1, 1]} : vector<24x16xf32> to vector<8x14xf32>
    %149 = arith.addf %147, %148 : vector<8x14xf32>
    %150 = vector.extract_strided_slice %145 {offsets = [16, 2], sizes = [8, 14], strides = [1, 1]} : vector<24x16xf32> to vector<8x14xf32>
    %151 = arith.addf %149, %150 : vector<8x14xf32>
    %152 = vector.extract_strided_slice %131 {offsets = [6, 0], sizes = [3, 16], strides = [1, 1]} : vector<16x16xbf16> to vector<3x16xbf16>
    %c2_85 = arith.constant 2 : index
    %c3_86 = arith.constant 3 : index
    %c0_87 = arith.constant 0 : index
    %c0_88 = arith.constant 0 : index
    %153 = vector.load %arg2[%c2_85, %c3_86, %c0_87, %c0_88] : memref<4x4x24x3xbf16, #tpu.memory_space<vmem>>, vector<1x1x24x3xbf16>
    %154 = vector.shape_cast %153 : vector<1x1x24x3xbf16> to vector<24x3xbf16>
    %cst_89 = arith.constant dense<0.000000e+00> : vector<24x16xf32>
    %155 = tpu.matmul %154, %152, %cst_89 {dimension_numbers = #tpu.dot_dimension_numbers<[1], [0], [0], [1], [0, 0, 1, 1], [], []>} : vector<24x3xbf16>, vector<3x16xbf16>, vector<24x16xf32> -> vector<24x16xf32>
    %156 = vector.extract_strided_slice %155 {offsets = [0, 0], sizes = [8, 14], strides = [1, 1]} : vector<24x16xf32> to vector<8x14xf32>
    %157 = arith.addf %119, %156 : vector<8x14xf32>
    %158 = vector.extract_strided_slice %155 {offsets = [8, 1], sizes = [8, 14], strides = [1, 1]} : vector<24x16xf32> to vector<8x14xf32>
    %159 = arith.addf %157, %158 : vector<8x14xf32>
    %160 = vector.extract_strided_slice %155 {offsets = [16, 2], sizes = [8, 14], strides = [1, 1]} : vector<24x16xf32> to vector<8x14xf32>
    %161 = arith.addf %159, %160 : vector<8x14xf32>
    %162 = vector.extract_strided_slice %131 {offsets = [9, 0], sizes = [3, 16], strides = [1, 1]} : vector<16x16xbf16> to vector<3x16xbf16>
    %c3_90 = arith.constant 3 : index
    %c3_91 = arith.constant 3 : index
    %c0_92 = arith.constant 0 : index
    %c0_93 = arith.constant 0 : index
    %163 = vector.load %arg2[%c3_90, %c3_91, %c0_92, %c0_93] : memref<4x4x24x3xbf16, #tpu.memory_space<vmem>>, vector<1x1x24x3xbf16>
    %164 = vector.shape_cast %163 : vector<1x1x24x3xbf16> to vector<24x3xbf16>
    %cst_94 = arith.constant dense<0.000000e+00> : vector<24x16xf32>
    %165 = tpu.matmul %164, %162, %cst_94 {dimension_numbers = #tpu.dot_dimension_numbers<[1], [0], [0], [1], [0, 0, 1, 1], [], []>} : vector<24x3xbf16>, vector<3x16xbf16>, vector<24x16xf32> -> vector<24x16xf32>
    %166 = vector.extract_strided_slice %165 {offsets = [0, 0], sizes = [8, 14], strides = [1, 1]} : vector<24x16xf32> to vector<8x14xf32>
    %167 = arith.addf %129, %166 : vector<8x14xf32>
    %168 = vector.extract_strided_slice %165 {offsets = [8, 1], sizes = [8, 14], strides = [1, 1]} : vector<24x16xf32> to vector<8x14xf32>
    %169 = arith.addf %167, %168 : vector<8x14xf32>
    %170 = vector.extract_strided_slice %165 {offsets = [16, 2], sizes = [8, 14], strides = [1, 1]} : vector<24x16xf32> to vector<8x14xf32>
    %171 = arith.addf %169, %170 : vector<8x14xf32>
    %c0_95 = arith.constant 0 : index
    %c0_96 = arith.constant 0 : index
    %c0_97 = arith.constant 0 : index
    %c0_98 = arith.constant 0 : index
    %172 = vector.load %arg3[%c0_95, %c0_96, %c0_97, %c0_98] : memref<1x4x8x14xf32, #tpu.memory_space<vmem>>, vector<1x1x8x14xf32>
    %173 = vector.shape_cast %172 : vector<1x1x8x14xf32> to vector<8x14xf32>
    %174 = vector.shape_cast %141 : vector<8x14xf32> to vector<1x1x8x14xf32>
    tpu.vector_store %arg3[%c0_95, %c0_96, %c0_97, %c0_98], %174 {strides = array<i32>} : memref<1x4x8x14xf32, #tpu.memory_space<vmem>>, vector<1x1x8x14xf32>,
    %c0_99 = arith.constant 0 : index
    %c1_100 = arith.constant 1 : index
    %c0_101 = arith.constant 0 : index
    %c0_102 = arith.constant 0 : index
    %175 = vector.load %arg3[%c0_99, %c1_100, %c0_101, %c0_102] : memref<1x4x8x14xf32, #tpu.memory_space<vmem>>, vector<1x1x8x14xf32>
    %176 = vector.shape_cast %175 : vector<1x1x8x14xf32> to vector<8x14xf32>
    %177 = vector.shape_cast %151 : vector<8x14xf32> to vector<1x1x8x14xf32>
    tpu.vector_store %arg3[%c0_99, %c1_100, %c0_101, %c0_102], %177 {strides = array<i32>} : memref<1x4x8x14xf32, #tpu.memory_space<vmem>>, vector<1x1x8x14xf32>,
    %c0_103 = arith.constant 0 : index
    %c2_104 = arith.constant 2 : index
    %c0_105 = arith.constant 0 : index
    %c0_106 = arith.constant 0 : index
    %178 = vector.load %arg3[%c0_103, %c2_104, %c0_105, %c0_106] : memref<1x4x8x14xf32, #tpu.memory_space<vmem>>, vector<1x1x8x14xf32>
    %179 = vector.shape_cast %178 : vector<1x1x8x14xf32> to vector<8x14xf32>
    %180 = vector.shape_cast %161 : vector<8x14xf32> to vector<1x1x8x14xf32>
    tpu.vector_store %arg3[%c0_103, %c2_104, %c0_105, %c0_106], %180 {strides = array<i32>} : memref<1x4x8x14xf32, #tpu.memory_space<vmem>>, vector<1x1x8x14xf32>,
    %c0_107 = arith.constant 0 : index
    %c3_108 = arith.constant 3 : index
    %c0_109 = arith.constant 0 : index
    %c0_110 = arith.constant 0 : index
    %181 = vector.load %arg3[%c0_107, %c3_108, %c0_109, %c0_110] : memref<1x4x8x14xf32, #tpu.memory_space<vmem>>, vector<1x1x8x14xf32>
    %182 = vector.shape_cast %181 : vector<1x1x8x14xf32> to vector<8x14xf32>
    %183 = vector.shape_cast %171 : vector<8x14xf32> to vector<1x1x8x14xf32>
    tpu.vector_store %arg3[%c0_107, %c3_108, %c0_109, %c0_110], %183 {strides = array<i32>} : memref<1x4x8x14xf32, #tpu.memory_space<vmem>>, vector<1x1x8x14xf32>,
    return
  }
  func.func @transform_0(%arg0: i32) -> (i32, i32, i32, i32) {
    %c0_i32 = arith.constant 0 : i32
    %c0_i32_0 = arith.constant 0 : i32
    %c0_i32_1 = arith.constant 0 : i32
    %c0_i32_2 = arith.constant 0 : i32
    return %arg0, %c0_i32, %c0_i32_0, %c0_i32_1 : i32, i32, i32, i32
  }
  func.func @transform_1(%arg0: i32) -> (i32, i32, i32, i32) {
    %c0_i32 = arith.constant 0 : i32
    %c0_i32_0 = arith.constant 0 : i32
    %c0_i32_1 = arith.constant 0 : i32
    %c0_i32_2 = arith.constant 0 : i32
    %c0_i32_3 = arith.constant 0 : i32
    return %c0_i32, %c0_i32_0, %c0_i32_1, %c0_i32_2 : i32, i32, i32, i32
  }
  func.func @transform_2(%arg0: i32) -> (i32, i32, i32, i32) {
    %c0_i32 = arith.constant 0 : i32
    %c0_i32_0 = arith.constant 0 : i32
    %c0_i32_1 = arith.constant 0 : i32
    %c0_i32_2 = arith.constant 0 : i32
    return %arg0, %c0_i32, %c0_i32_0, %c0_i32_1 : i32, i32, i32, i32
  }
}

</mosaic_0001>

<bundles_post_ra>
// kernel: tpu_custom_call.1
= control target key start
LH: loop header
LB: loop body
LE: loop exit
PB: predicated region body
PF: predicated region fallthrough
CT: control target
= control target key end

     0   :  { %7 = vsyncpa [#allocation3], 0  ;;  %s1773_s0 = inlined_call_operand.vmem [shape: bf16[2,4,16,16], index: 0, kind: input, shape index: {}]   ;;  %s1774_s1 = inlined_call_operand.vmem [shape: bf16[4,4,24,3], index: 1, kind: input, shape index: {}]   ;;  %s1775_s2 = inlined_call_operand.hbm [shape: f32[2,4,8,14], index: 2, kind: output, shape index: {}]  }
   0x1   :  { %9 = vsyncpa [#allocation3 + $0x1], 0  ;;  %s1444_s9 = smov 0   ;;  %s1446_s10 = smov 0  }
   0x2   :  { %s1448_s11 = smov 0   ;;  %s1450_s12 = smov 0  }
   0x3 LB: > { %s1465_s13 = sadd.s32 4294967295, %s1422_s12   ;;  %s1136_s14 = sadd.s32 4294967294, %s1422_s12   ;;  %s1422_s12 = sphi %s1450_s12, %s1781_s12   ;;  %s1418_s11 = sphi %s1448_s11, %s1780_s11   ;;  %s1414_s10 = sphi %s1446_s10, %s1779_s10   ;;  %s1410_s9 = sphi %s1444_s9, %s1778_s9  }
   0x4   : > { %s1469_s15 = sadd.s32 1, %s1422_s12   ;;  %s69_s16 = sadd.s32 1, %s1418_s11 }
   0x5   : > { %s66_s17 = ssub.s32 %s1422_s12, %s1469_s15  ;;  %p79_p0 = scmp.ne.s32.totalorder %s1418_s11, %s1414_s10 }
   0x6   : > { %p67_p1 = scmp.eq.s32.totalorder %s66_s17, 0  ;;  %p80_p2 = scmp.eq.s32.totalorder %s1465_s13, 1 }
   0x7   : > { %p85_p3 = scmp.ne.s32.totalorder %s1414_s10, %s1410_s9  ;;  %p86_p4 = scmp.eq.s32.totalorder %s1136_s14, 1 }
   0x8   : > { %s1480_s18 = scalar_select %p67_p1, %s1418_s11, %s69_s16  }
   0x9   : > { %p1482_p5 = por %p80_p2, %p79_p0  ;;  %p1486_p6 = por %p86_p4, %p85_p3 }
   0xa   : > { %p1139_p7 = scmp.ge.s32.totalorder %s1422_s12, 1  ;;  %p115_p8 = scmp.lt.s32.totalorder %s1422_s12, 3 }
   0xc   : > { %p116_p9 = pnand %p1139_p7, %p115_p8 }
   0xd   : > { %p137_p10 = scmp.lt.s32.totalorder (!%p116_p9), %s1465_s13, 1  ;;  %s1425_s6 = smov (!%p116_p9), 127  }
   0xe   : > { %119 = sbr.rel (%p116_p9) target bundleno = 406 (0x196), region = 28  ;;  %s1426_s7 = smov (!%p116_p9), 126  }
   0xf   : > { %s134_s8 = sand.u32 (!%p116_p9), 1, %s1414_s10   ;;  %s1315_s17 = sshll.u32 (!%p116_p9), %s1465_s13, 5 }
  0x10   : > { %s1140_s14 = sshll.u32 (!%p116_p9), %s134_s8, 5  ;;  %s1380_s30 = scalar_lea.hbm (!%p116_p9), %s1775_s2, 64 }
  0x11   : > { %s136_s16 = scalar_lea.vmem (!%p116_p9), [#allocation2], %s1140_s14 }
  0x12   : > { %s1071_s23 = sshll.u32 (!%p116_p9), %s136_s16, 4  ;;  %s1072_s23 = int_to_ptr.vmem [resolvable:$true] %s1071_s23 }
  0x13   : > { %vm163_vm0 = vcmask 1040384   ;;  %vm164_vm1 = vcmask 1041408   ;;  %v1424_v0 = vmov 65535   ;;  %s138_s21 = scalar_select %p137_p10, %s1465_s13, 1  ;;  %v1299_v11 = vld [vmem:[%s1774_s1] sm:$0xff]  ;;  %vm156_vm2 = vcmask 23552  }
  0x14   : > { %v165_v1 = vsel %vm163_vm0, 4294967295, %v1424_v0  ;;  %v1301_v37 = vld [vmem:[%s1774_s1 + $0x60] sm:$0xff]  ;;  %v147_v45 = vld [vmem:[%s1774_s1 + $0x8] sm:$0xf]  ;;  %v1300_v48 = vld [vmem:[%s1774_s1 + $0x30] sm:$0xff]  ;;  %vm1050_vm3 = vcmask 113664  }
  0x15   : > { %s1298_s22 = sshll.u32 %s138_s21, 5  ;;  %v1494_v2 = vsel %vm164_vm1, %v165_v1, 0  ;;  %v1302_v49 = vld [vmem:[%s1774_s1 + $0x90] sm:$0xff]  ;;  %v153_v52 = vunpack.c.l.b16 %v147_v45  ;;  %v1160_v56 = vld [vmem:[%s1774_s1 + $0x68] sm:$0xf]  ;;  %s1059_s13 = scalar_lea.sflag [#allocation3], %s134_s8 }
  0x16   : > { %s1499_s25 = scalar_lea.vmem %s1773_s0, %s1298_s22  ;;  %v269_v61 = vunpack.c.l.b16 %v1160_v56  ;;  %v1151_v62 = vld [vmem:[%s1774_s1 + $0x38] sm:$0xf]  ;;  %s1070_s22 = scalar_lea.hbm %s1775_s2, %s1315_s17 }
  0x17   : > { %v143_v3 = vld [vmem:[%s1499_s25] sm:$0xf]  ;;  %v1176_v4 = vld [vmem:[%s1499_s25 + $0x8] sm:$0xf]  ;;  %v144_v5 = vld [vmem:[%s1499_s25 + $0x4] sm:$0xf]  ;;  %v155_v55 = vpack.c.b16 %v153_v52, %v153_v52 }
  0x18   : > { %v168_v6 = vand.u32 %v1494_v2, %v143_v3  ;;  %v212_v7 = vunpack.c.l.b16 %v143_v3  ;;  %v394_v8 = vand.u32 %v1176_v4, %v1494_v2  ;;  %v438_v9 = vunpack.c.l.b16 %v1176_v4  ;;  %v1177_v10 = vld [vmem:[%s1499_s25 + $0xc] sm:$0xf]  ;;  %v1214_v28 = vld [vmem:[%s1499_s25 + $0x10] sm:$0xf]  ;;  %v1215_v54 = vld [vmem:[%s1499_s25 + $0x14] sm:$0xf] }
  0x19   : > { %v273_v12 = vunpack.c.l.b16 %v144_v5  ;;  %v499_v13 = vunpack.c.l.b16 %v1177_v10  ;;  %v620_v41 = vand.u32 %v1214_v28, %v1494_v2  ;;  %v664_v53 = vunpack.c.l.b16 %v1214_v28  ;;  %v1169_v63 = vld [vmem:[%s1774_s1 + $0x98] sm:$0xf]  ;;  %v1253_v28 = vld [vmem:[%s1499_s25 + $0x1c] sm:$0xf]  ;;  %s1073_s24 = sshll.u32 %s1070_s22, 4  ;;  %s1074_s24 = int_to_ptr.hbm [resolvable:$true] %s1073_s24 }
  0x1a   : > { %177 = vmatpush.bf16.msra.mxu0 %v168_v6  ;;  %v213_v14 = vpack.c.b16 %v212_v7, %v212_v7  ;;  %v439_v15 = vpack.c.b16 %v438_v9, %v438_v9  ;;  %v725_v58 = vunpack.c.l.b16 %v1215_v54  ;;  %v208_v6 = vunpack.c.l.b16 %v1151_v62  ;;  %v1307_v56 = vld [vmem:[%s1774_s1 + $0x18] sm:$0xff]  ;;  %v1236_v62 = vld [vmem:[%s1774_s1 + $0x80] sm:$0xf]  ;;  %s1374_s26 = sshra.s32 %s1074_s24, 4  ;;  %s1375_s26 = int_to_ptr.hbm [resolvable:$true] %s1374_s26 }
  0x1b   : > { %v274_v16 = vpack.c.b16 %v273_v12, %v212_v7  ;;  %v326_v17 = vpack.c.b16 %v273_v12, %v273_v12  ;;  %v500_v18 = vpack.c.b16 %v499_v13, %v438_v9  ;;  %v552_v19 = vpack.c.b16 %v499_v13, %v499_v13  ;;  %s1376_s27 = scalar_lea.hbm %s1375_s26, 32  ;;  %p1381_p0 = scmp.lt.s32.totalorder %s1375_s26, %s1775_s2 }
  0x1c   : > { %v215_v20 = vshrl.u32 %v213_v14, 16  ;;  %v218_v21 = vshll.u32 %v213_v14, 16  ;;  %v441_v22 = vshrl.u32 %v439_v15, 16  ;;  %v444_v23 = vshll.u32 %v439_v15, 16  ;;  %p1377_p11 = scmp.ne.s32.totalorder %s1375_s26, %s1376_s27  ;;  %p1382_p1 = scmp.lt.s32.totalorder %s1380_s30, %s1376_s27 }
  0x1d   : > { %1147 = vmatmul.msk.bf16.vlgmr.msra.gmra.mxu0 %vm156_vm2, %v1299_v11  ;;  %v275_v24 = vrot.slane %v274_v16, 3  ;;  %v328_v25 = vshrl.u32 %v326_v17, 16  ;;  %v330_v26 = vshll.u32 %v326_v17, 16  ;;  %v501_v27 = vrot.slane %v500_v18, 3 }
  0x1e   : > { %403 = vmatpush.bf16.msrb.mxu0 %v394_v8  ;;  %v217_v29 = vrot.slane %v215_v20, 1  ;;  %v220_v30 = vrot.slane %v218_v21, 2  ;;  %v554_v31 = vshrl.u32 %v552_v19, 16  ;;  %v556_v32 = vshll.u32 %v552_v19, 16  ;;  %v1303_v19 = vld [vmem:[%s1774_s1 + $0xc] sm:$0xff]  ;;  %p1378_p12 = pnand %p1377_p11, %p1482_p5  ;;  %p1383_p2 = por %p1382_p1, %p1381_p0 }
  0x1f   : > { %v283_v33 = vand.u32 %v275_v24, %v1494_v2  ;;  %v332_v34 = vrot.slane %v330_v26, 1  ;;  %v509_v35 = vand.u32 %v501_v27, %v1494_v2  ;;  %v443_v36 = vrot.slane %v441_v22, 1  ;;  %v1252_v20 = vld [vmem:[%s1499_s25 + $0x18] sm:$0xf]  ;;  %v1305_v22 = vld [vmem:[%s1774_s1 + $0x6c] sm:$0xff]  ;;  %v1304_v24 = vld [vmem:[%s1774_s1 + $0x3c] sm:$0xff] }
  0x20   : > { %v221_v38 = vor.u32 %v220_v30, %v217_v29  ;;  %v558_v39 = vrot.slane %v556_v32, 1  ;;  %v446_v40 = vrot.slane %v444_v23, 2  ;;  %v665_v57 = vpack.c.b16 %v664_v53, %v664_v53  ;;  %v1180_v23 = vld [vmem:[%s1774_s1 + $0x14] sm:$0xf]  ;;  %p1379_p13 = pneg %p1378_p12 }
  0x21   : > { %292 = vmatpush.bf16.msra.mxu2 %v283_v33  ;;  %v333_v42 = vor.u32 %v332_v34, %v328_v25  ;;  %v726_v59 = vpack.c.b16 %v725_v58, %v664_v53  ;;  %v778_v60 = vpack.c.b16 %v725_v58, %v725_v58  ;;  %v271_v10 = vpack.c.b16 %v269_v61, %v269_v61  ;;  %v1306_v25 = vld [vmem:[%s1774_s1 + $0x9c] sm:$0xff]  ;;  %v1198_v30 = vld [vmem:[%s1774_s1 + $0x74] sm:$0xf]  ;;  %v1308_v58 = vld [vmem:[%s1774_s1 + $0x48] sm:$0xff] }
  0x22   : > { %v229_v43 = vand.u32 %v221_v38, %v1494_v2  ;;  %v559_v44 = vor.u32 %v558_v39, %v554_v31  ;;  %v447_v46 = vor.u32 %v446_v40, %v443_v36  ;;  %629 = vmatpush.bf16.msra.mxu0 %v620_v41  ;;  %v667_v4 = vshrl.u32 %v665_v57, 16  ;;  %v1189_v36 = vld [vmem:[%s1774_s1 + $0x44] sm:$0xf]  ;;  %p1384_p3 = pnand %p1383_p2, %p1379_p13 }
  0x23   : > { %v341_v47 = vand.u32 %v333_v42, %v1494_v2  ;;  %v727_v0 = vrot.slane %v726_v59, 3  ;;  %v780_v1 = vshrl.u32 %v778_v60, 16  ;;  %v782_v3 = vshll.u32 %v778_v60, 16  ;;  %v1310_v59 = vld [vmem:[%s1774_s1 + $0xa8] sm:$0xff] }
  0x24   : > { %1165 = vmatmul.msk.bf16.vlgmr.msra.gmra.mxu2 %vm156_vm2, %v1301_v37  ;;  %238 = vmatpush.bf16.msra.mxu1 %v229_v43  ;;  %v567_v50 = vand.u32 %v559_v44, %v1494_v2  ;;  %v455_v51 = vand.u32 %v447_v46, %v1494_v2  ;;  %v670_v5 = vshll.u32 %v665_v57, 16  ;;  %v669_v9 = vrot.slane %v667_v4, 1  ;;  %v1207_v37 = vld [vmem:[%s1774_s1 + $0xa4] sm:$0xf]  ;;  %v1309_v57 = vld [vmem:[%s1774_s1 + $0x78] sm:$0xff] }
  0x25   : > { %518 = vmatpush.bf16.msrb.mxu2 %v509_v35  ;;  %350 = vmatpush.bf16.msra.mxu3 %v341_v47  ;;  %v735_v7 = vand.u32 %v727_v0, %v1494_v2  ;;  %v784_v8 = vrot.slane %v782_v3, 1  ;;  %v323_v11 = vunpack.c.l.b16 %v1169_v63  ;;  %v210_v15 = vpack.c.b16 %v208_v6, %v208_v6  ;;  %v1227_v0 = vld [vmem:[%s1774_s1 + $0x50] sm:$0xf] }
  0x26   : > { %v672_v12 = vrot.slane %v670_v5, 2  ;;  %v846_v21 = vand.u32 %v1252_v20, %v1494_v2  ;;  %v384_v26 = vunpack.c.l.b16 %v1180_v23  ;;  %v890_v27 = vunpack.c.l.b16 %v1252_v20 }
  0x27   : > { %1156 = vmatmul.msk.bf16.vlgmr.msra.gmra.mxu1 %vm156_vm2, %v1300_v48  ;;  %v785_v13 = vor.u32 %v784_v8, %v780_v1  ;;  %v325_v17 = vpack.c.b16 %v323_v11, %v323_v11  ;;  %v951_v32 = vunpack.c.l.b16 %v1253_v28  ;;  %v495_v35 = vunpack.c.l.b16 %v1198_v30  ;;  %v1245_v1 = vld [vmem:[%s1774_s1 + $0xb0] sm:$0xf]  ;;  %v1311_v8 = vld [vmem:[%s1774_s1 + $0x24] sm:$0xff]  ;;  %v1312_v11 = vld [vmem:[%s1774_s1 + $0x54] sm:$0xff] }
  0x28   : > { %464 = vmatpush.bf16.msrb.mxu1 %v455_v51  ;;  %1174 = vmatmul.msk.bf16.vlgmr.msra.gmra.mxu3 %vm156_vm2, %v1302_v49  ;;  %v673_v14 = vor.u32 %v672_v12, %v669_v9  ;;  %v386_v29 = vpack.c.b16 %v384_v26, %v384_v26  ;;  %v891_v31 = vpack.c.b16 %v890_v27, %v890_v27  ;;  %v434_v43 = vunpack.c.l.b16 %v1189_v36  ;;  %v1313_v9 = vld [vmem:[%s1774_s1 + $0x84] sm:$0xff]  ;;  %v1314_v12 = vld [vmem:[%s1774_s1 + $0xb4] sm:$0xff] }
  0x29   : > { %576 = vmatpush.bf16.msrb.mxu3 %v567_v50  ;;  %744 = vmatpush.bf16.msra.mxu2 %v735_v7  ;;  %v793_v16 = vand.u32 %v785_v13, %v1494_v2  ;;  %v952_v33 = vpack.c.b16 %v951_v32, %v890_v27  ;;  %v1004_v34 = vpack.c.b16 %v951_v32, %v951_v32  ;;  %v549_v48 = vunpack.c.l.b16 %v1207_v37 }
  0x2a   : > { %v681_v18 = vand.u32 %v673_v14, %v1494_v2  ;;  %v893_v41 = vshrl.u32 %v891_v31, 16  ;;  %v896_v42 = vshll.u32 %v891_v31, 16  ;;  %v497_v47 = vpack.c.b16 %v495_v35, %v495_v35 }
  0x2b   : > { %v953_v38 = vrot.slane %v952_v33, 3  ;;  %v1006_v39 = vshrl.u32 %v1004_v34, 16  ;;  %v1008_v40 = vshll.u32 %v1004_v34, 16  ;;  %v436_v52 = vpack.c.b16 %v434_v43, %v434_v43 }
  0x2c   : > { %690 = vmatpush.bf16.msra.mxu1 %v681_v18  ;;  %v895_v46 = vrot.slane %v893_v41, 1  ;;  %v898_v49 = vrot.slane %v896_v42, 2  ;;  %v551_v54 = vpack.c.b16 %v549_v48, %v549_v48  ;;  %v721_v63 = vunpack.c.l.b16 %v1236_v62  ;;  %v1283_v18 = vld [vmem:[%s1774_s1 + $0xbc] sm:$0xf] }
  0x2d   : > { %1148 = vmatmul.msk.bf16.gmra.mxu0 %vm156_vm2, %v155_v55  ;;  %802 = vmatpush.bf16.msra.mxu3 %v793_v16  ;;  %v961_v44 = vand.u32 %v953_v38, %v1494_v2  ;;  %v1010_v45 = vrot.slane %v1008_v40, 1  ;;  %v660_v3 = vunpack.c.l.b16 %v1227_v0  ;;  %v775_v5 = vunpack.c.l.b16 %v1245_v1 }
  0x2e   : > { %v899_v51 = vor.u32 %v898_v49, %v895_v46  ;;  %v723_v4 = vpack.c.b16 %v721_v63, %v721_v63 }
  0x2f   : > { %v1011_v50 = vor.u32 %v1010_v45, %v1006_v39  ;;  %v662_v6 = vpack.c.b16 %v660_v3, %v660_v3  ;;  %v777_v7 = vpack.c.b16 %v775_v5, %v775_v5 }
  0x30   : > { %v907_v55 = vand.u32 %v899_v51, %v1494_v2 }
  0x31   : > { %v1019_v53 = vand.u32 %v1011_v50, %v1494_v2  ;;  %v1218_v2 = vld [vmem:[%s1774_s1 + $0x20] sm:$0xf] }
  0x32   : > { %v610_v60 = vunpack.c.l.b16 %v1218_v2 }
  0x34   : > { %1166 = vmatmul.msk.bf16.gmra.mxu2 %vm156_vm2, %v271_v10  ;;  %v612_v61 = vpack.c.b16 %v610_v60, %v610_v60  ;;  %v1256_v10 = vld [vmem:[%s1774_s1 + $0x2c] sm:$0xf] }
  0x35   : > { %v836_v13 = vunpack.c.l.b16 %v1256_v10 }
  0x37   : > { %1157 = vmatmul.msk.bf16.gmra.mxu1 %vm156_vm2, %v210_v15  ;;  %v838_v14 = vpack.c.b16 %v836_v13, %v836_v13  ;;  %v1274_v15 = vld [vmem:[%s1774_s1 + $0x8c] sm:$0xf] }
  0x38   : > { %1175 = vmatmul.msk.bf16.gmra.mxu3 %vm156_vm2, %v325_v17  ;;  %v947_v16 = vunpack.c.l.b16 %v1274_v15  ;;  %v1265_v17 = vld [vmem:[%s1774_s1 + $0x5c] sm:$0xf] }
  0x3a   : > { %v949_v20 = vpack.c.b16 %v947_v16, %v947_v16 }
  0x3d   : > { %1185 = vmatmul.msk.bf16.vlgmr.msrb.gmra.mxu0 %vm156_vm2, %v1303_v19  ;;  %v886_v19 = vunpack.c.l.b16 %v1265_v17 }
  0x3e   : > { %855 = vmatpush.bf16.msrb.mxu0 %v846_v21  ;;  %v1001_v21 = vunpack.c.l.b16 %v1283_v18 }
  0x40   : > { %v1003_v23 = vpack.c.b16 %v1001_v21, %v1001_v21 }
  0x44   : > { %1203 = vmatmul.msk.bf16.vlgmr.msrb.gmra.mxu2 %vm156_vm2, %v1305_v22  ;;  %v888_v22 = vpack.c.b16 %v886_v19, %v886_v19 }
  0x45   : > { %970 = vmatpush.bf16.msrb.mxu2 %v961_v44 }
  0x47   : > { %1194 = vmatmul.msk.bf16.vlgmr.msrb.gmra.mxu1 %vm156_vm2, %v1304_v24 }
  0x48   : > { %1212 = vmatmul.msk.bf16.vlgmr.msrb.gmra.mxu3 %vm156_vm2, %v1306_v25  ;;  %916 = vmatpush.bf16.msrb.mxu1 %v907_v55 }
  0x49   : > { %1028 = vmatpush.bf16.msrb.mxu3 %v1019_v53 }
  0x4d   : > { %1186 = vmatmul.msk.bf16.gmra.mxu0 %vm156_vm2, %v386_v29 }
  0x54   : > { %1204 = vmatmul.msk.bf16.gmra.mxu2 %vm156_vm2, %v497_v47 }
  0x57   : > { %1195 = vmatmul.msk.bf16.gmra.mxu1 %vm156_vm2, %v436_v52 }
  0x58   : > { %1213 = vmatmul.msk.bf16.gmra.mxu3 %vm156_vm2, %v551_v54 }
  0x5d   : > { %1223 = vmatmul.msk.bf16.vlgmr.msra.gmra.mxu0 %vm156_vm2, %v1307_v56 }
  0x64   : > { %1241 = vmatmul.msk.bf16.vlgmr.msra.gmra.mxu2 %vm156_vm2, %v1309_v57 }
  0x67   : > { %1232 = vmatmul.msk.bf16.vlgmr.msra.gmra.mxu1 %vm156_vm2, %v1308_v58 }
  0x68   : > { %1250 = vmatmul.msk.bf16.vlgmr.msra.gmra.mxu3 %vm156_vm2, %v1310_v59 }
  0x6d   : > { %1224 = vmatmul.msk.bf16.gmra.mxu0 %vm156_vm2, %v612_v61 }
  0x74   : > { %1242 = vmatmul.msk.bf16.gmra.mxu2 %vm156_vm2, %v723_v4 }
  0x77   : > { %1233 = vmatmul.msk.bf16.gmra.mxu1 %vm156_vm2, %v662_v6 }
  0x78   : > { %1251 = vmatmul.msk.bf16.gmra.mxu3 %vm156_vm2, %v777_v7 }
  0x7d   : > { %1261 = vmatmul.msk.bf16.vlgmr.msrb.gmra.mxu0 %vm156_vm2, %v1311_v8 }
  0x84   : > { %1279 = vmatmul.msk.bf16.vlgmr.msrb.gmra.mxu2 %vm156_vm2, %v1313_v9 }
  0x87   : > { %1270 = vmatmul.msk.bf16.vlgmr.msrb.gmra.mxu1 %vm156_vm2, %v1312_v11 }
  0x88   : > { %1288 = vmatmul.msk.bf16.vlgmr.msrb.gmra.mxu3 %vm156_vm2, %v1314_v12 }
  0x8d   : > { %1262 = vmatmul.msk.bf16.gmra.mxu0 %vm156_vm2, %v838_v14 }
  0x94   : > { %1280 = vmatmul.msk.bf16.gmra.mxu2 %vm156_vm2, %v949_v20 }
  0x97   : > { %1271 = vmatmul.msk.bf16.gmra.mxu1 %vm156_vm2, %v888_v22 }
  0x98   : > { %1289 = vmatmul.msk.bf16.gmra.mxu3 %vm156_vm2, %v1003_v23 }
  0x9a   : > { %v1653_v24 = vpop.f32.mrf.mxu0 }
  0xa2   : > { %v181_v25 = vpop.f32.mrf.mxu0 }
  0xa3   : > { %190 = vrot.lane.b32.xlu0 %v181_v25, %s1425_s6 }
  0xa4   : > { %v1656_v26 = vpop.f32.mrf.mxu1 }
  0xa7   : > { %v1658_v27 = vpop.f32.mrf.mxu2 }
  0xaa   : > { %v184_v28 = vpop.f32.mrf.mxu0 }
  0xab   : > { %v1660_v29 = vpop.f32.mrf.mxu3  ;;  %195 = vrot.lane.b32.xlu0 %v184_v28, %s1426_s7 }
  0xac   : > { %v242_v30 = vpop.f32.mrf.mxu1 }
  0xad   : > { %251 = vrot.lane.b32.xlu1 %v242_v30, %s1425_s6 }
  0xaf   : > { %v296_v31 = vpop.f32.mrf.mxu2 }
  0xb0   : > { %305 = vrot.lane.b32.xlu2 %v296_v31, %s1425_s6 }
  0xb2   : > { %v186_v32 = vpop.f32.mrf.mxu0 }
  0xb3   : > { %v354_v33 = vpop.f32.mrf.mxu3 }
  0xb4   : > { %363 = vrot.lane.b32.xlu0 %v354_v33, %s1425_s6  ;;  %v245_v34 = vpop.f32.mrf.mxu1 }
  0xb5   : > { %256 = vrot.lane.b32.xlu1 %v245_v34, %s1426_s7 }
  0xb7   : > { %v299_v35 = vpop.f32.mrf.mxu2 }
  0xb8   : > { %310 = vrot.lane.b32.xlu2 %v299_v35, %s1426_s7 }
  0xba   : > { %v1668_v36 = vpop.f32.mrf.mxu0 }
  0xbb   : > { %v357_v37 = vpop.f32.mrf.mxu3 }
  0xbc   : > { %v247_v38 = vpop.f32.mrf.mxu1 }
  0xbd   : > { %368 = vrot.lane.b32.xlu1 %v357_v37, %s1426_s7 }
  0xbf   : > { %v301_v39 = vpop.f32.mrf.mxu2 }
  0xc2   : > { %v407_v40 = vpop.f32.mrf.mxu0 }
  0xc3   : > { %v359_v41 = vpop.f32.mrf.mxu3  ;;  %416 = vrot.lane.b32.xlu2 %v407_v40, %s1425_s6 }
  0xc4   : > { %v1672_v42 = vpop.f32.mrf.mxu1 }
  0xc7   : > { %v1674_v43 = vpop.f32.mrf.mxu2 }
  0xca   : > { %v410_v44 = vpop.f32.mrf.mxu0 }
  0xcb   : > { %v1676_v45 = vpop.f32.mrf.mxu3  ;;  %421 = vrot.lane.b32.xlu0 %v410_v44, %s1426_s7 }
  0xcc   : > { %v468_v46 = vpop.f32.mrf.mxu1 }
  0xcd   : > { %477 = vrot.lane.b32.xlu1 %v468_v46, %s1425_s6 }
  0xcf   : > { %v522_v47 = vpop.f32.mrf.mxu2 }
  0xd2   : > { %v412_v48 = vpop.f32.mrf.mxu0 }
  0xd3   : > { %v580_v49 = vpop.f32.mrf.mxu3  ;;  %531 = vrot.lane.b32.xlu0 %v522_v47, %s1425_s6 }
  0xd4   : > { %589 = vrot.lane.b32.xlu2 %v580_v49, %s1425_s6  ;;  %v471_v50 = vpop.f32.mrf.mxu1 }
  0xd7   : > { %v525_v51 = vpop.f32.mrf.mxu2 }
  0xd8   : > { %536 = vrot.lane.b32.xlu1 %v525_v51, %s1426_s7 }
  0xda   : > { %v1683_v52 = vpop.f32.mrf.mxu0 }
  0xdb   : > { %v583_v53 = vpop.f32.mrf.mxu3 }
  0xdc   : > { %482 = vrot.lane.b32.xlu2 %v471_v50, %s1426_s7  ;;  %594 = vrot.lane.b32.xlu0 %v583_v53, %s1426_s7  ;;  %v473_v54 = vpop.f32.mrf.mxu1 }
  0xdf   : > { %v527_v55 = vpop.f32.mrf.mxu2 }
  0xe2   : > { %v633_v56 = vpop.f32.mrf.mxu0 }
  0xe3   : > { %v585_v57 = vpop.f32.mrf.mxu3  ;;  %642 = vrot.lane.b32.xlu1 %v633_v56, %s1425_s6 }
  0xe4   : > { %v1688_v2 = vpop.f32.mrf.mxu1 }
  0xe7   : > { %v1690_v58 = vpop.f32.mrf.mxu2 }
  0xea   : > { %v636_v59 = vpop.f32.mrf.mxu0 }
  0xeb   : > { %v1692_v60 = vpop.f32.mrf.mxu3  ;;  %647 = vrot.lane.b32.xlu2 %v636_v59, %s1426_s7 }
  0xec   : > { %v694_v61 = vpop.f32.mrf.mxu1 }
  0xef   : > { %v748_v62 = vpop.f32.mrf.mxu2 }
  0xf0   : > { %757 = vrot.lane.b32.xlu0 %v748_v62, %s1425_s6 }
  0xf2   : > { %v638_v63 = vpop.f32.mrf.mxu0 }
  0xf3   : > { %v806_v0 = vpop.f32.mrf.mxu3  ;;  %703 = vrot.lane.b32.xlu2 %v694_v61, %s1425_s6 }
  0xf4   : > { %815 = vrot.lane.b32.xlu1 %v806_v0, %s1425_s6  ;;  %v697_v1 = vpop.f32.mrf.mxu1 }
  0xf7   : > { %v751_v3 = vpop.f32.mrf.mxu2 }
  0xf8   : > { %708 = vrot.lane.b32.xlu0 %v697_v1, %s1426_s7 }
  0xfa   : > { %v1699_v4 = vpop.f32.mrf.mxu0 }
  0xfb   : > { %v809_v5 = vpop.f32.mrf.mxu3 }
  0xfc   : > { %762 = vrot.lane.b32.xlu1 %v751_v3, %s1426_s7  ;;  %820 = vrot.lane.b32.xlu2 %v809_v5, %s1426_s7  ;;  %v699_v6 = vpop.f32.mrf.mxu1 }
  0xff   : > { %v753_v7 = vpop.f32.mrf.mxu2 }
 0x102   : > { %v859_v8 = vpop.f32.mrf.mxu0 }
 0x103   : > { %v811_v9 = vpop.f32.mrf.mxu3  ;;  %868 = vrot.lane.b32.xlu0 %v859_v8, %s1425_s6 }
 0x104   : > { %v1704_v10 = vpop.f32.mrf.mxu1 }
 0x107   : > { %v1706_v11 = vpop.f32.mrf.mxu2 }
 0x10a   : > { %v862_v12 = vpop.f32.mrf.mxu0  ;;  %v306_v28 = vpop.permute.xlu2 %305 }
 0x10b   : > { %v1708_v13 = vpop.f32.mrf.mxu3  ;;  %873 = vrot.lane.b32.xlu1 %v862_v12, %s1426_s7 }
 0x10c   : > { %v920_v14 = vpop.f32.mrf.mxu1 }
 0x10f   : > { %v974_v15 = vpop.f32.mrf.mxu2 }
 0x110   : > { %983 = vrot.lane.b32.xlu2 %v974_v15, %s1425_s6 }
 0x112   : > { %v864_v16 = vpop.f32.mrf.mxu0  ;;  %v311_v32 = vpop.permute.xlu2 %310 }
 0x113   : > { %v1032_v17 = vpop.f32.mrf.mxu3  ;;  %929 = vrot.lane.b32.xlu1 %v920_v14, %s1425_s6 }
 0x114   : > { %1041 = vrot.lane.b32.xlu0 %v1032_v17, %s1425_s6  ;;  %v923_v18 = vpop.f32.mrf.mxu1 }
 0x115   : > { %v191_v25 = vpop.permute.xlu0 %190 }
 0x116   : > { %v193_v48 = vadd.f32 %v191_v25, %v1653_v24 }
 0x117   : > { %v977_v19 = vpop.f32.mrf.mxu2 }
 0x118   : > { %934 = vrot.lane.b32.xlu2 %v923_v18, %s1426_s7 }
 0x11b   : > { %v1035_v20 = vpop.f32.mrf.mxu3 }
 0x11c   : > { %988 = vrot.lane.b32.xlu0 %v977_v19, %s1426_s7  ;;  %1046 = vrot.lane.b32.xlu1 %v1035_v20, %s1426_s7  ;;  %v925_v21 = vpop.f32.mrf.mxu1 }
 0x11d   : > { %v196_v31 = vpop.permute.xlu0 %195  ;;  %v417_v35 = vpop.permute.xlu2 %416 }
 0x11e   : > { %v198_v50 = vadd.f32 %v196_v31, %v193_v48 }
 0x11f   : > { %v979_v22 = vpop.f32.mrf.mxu2  ;;  %v252_v30 = vpop.permute.xlu1 %251 }
 0x120   : > { %v414_v53 = vadd.f32 %v1668_v36, %v198_v50  ;;  %v254_v59 = vadd.f32 %v252_v30, %v1656_v26  ;;  %v308_v36 = vadd.f32 %v306_v28, %v1658_v27 }
 0x122   : > { %v419_v55 = vadd.f32 %v417_v35, %v414_v53  ;;  %v313_v7 = vadd.f32 %v311_v32, %v308_v36 }
 0x123   : > { %v1037_v23 = vpop.f32.mrf.mxu3 }
 0x126   : > { %v364_v34 = vpop.permute.xlu0 %363 }
 0x127   : > { %v257_v33 = vpop.permute.xlu1 %256  ;;  %v366_v0 = vadd.f32 %v364_v34, %v1660_v29 }
 0x128   : > { %v259_v62 = vadd.f32 %v257_v33, %v254_v59 }
 0x12a   : > { %v475_v24 = vadd.f32 %v1672_v42, %v259_v62 }
 0x12e   : > { %v590_v39 = vpop.permute.xlu2 %589 }
 0x12f   : > { %v369_v37 = vpop.permute.xlu1 %368 }
 0x130   : > { %v371_v5 = vadd.f32 %v369_v37, %v366_v0 }
 0x132   : > { %v587_v12 = vadd.f32 %v1676_v45, %v371_v5 }
 0x134   : > { %v592_v16 = vadd.f32 %v590_v39, %v587_v12 }
 0x136   : > { %v483_v44 = vpop.permute.xlu2 %482 }
 0x13d   : > { %v422_v38 = vpop.permute.xlu0 %421 }
 0x13e   : > { %v424_v61 = vadd.f32 %v422_v38, %v419_v55 }
 0x13f   : > { %v478_v40 = vpop.permute.xlu1 %477 }
 0x140   : > { %v640_v63 = vadd.f32 %v1683_v52, %v424_v61  ;;  %v480_v6 = vadd.f32 %v478_v40, %v475_v24  ;;  %v529_v52 = vadd.f32 %v1674_v43, %v313_v7 }
 0x142   : > { %v485_v14 = vadd.f32 %v483_v44, %v480_v6 }
 0x144   : > { %v701_v27 = vadd.f32 %v1688_v2, %v485_v14 }
 0x145   : > { %v532_v41 = vpop.permute.xlu0 %531  ;;  %v648_v49 = vpop.permute.xlu2 %647 }
 0x146   : > { %v534_v42 = vadd.f32 %v532_v41, %v529_v52 }
 0x14a   : > { %v537_v46 = vpop.permute.xlu1 %536 }
 0x14b   : > { %v539_v18 = vadd.f32 %v537_v46, %v534_v42 }
 0x14d   : > { %v704_v56 = vpop.permute.xlu2 %703  ;;  %v755_v43 = vadd.f32 %v1690_v58, %v539_v18 }
 0x14e   : > { %v595_v47 = vpop.permute.xlu0 %594  ;;  %v706_v45 = vadd.f32 %v704_v56, %v701_v27 }
 0x14f   : > { %v597_v19 = vadd.f32 %v595_v47, %v592_v16 }
 0x155   : > { %v643_v51 = vpop.permute.xlu1 %642 }
 0x156   : > { %v645_v3 = vadd.f32 %v643_v51, %v640_v63  ;;  %v821_v8 = vpop.permute.xlu2 %820 }
 0x158   : > { %v650_v26 = vadd.f32 %v648_v49, %v645_v3 }
 0x15a   : > { %v866_v15 = vadd.f32 %v1699_v4, %v650_v26  ;;  %v813_v4 = vadd.f32 %v1692_v60, %v597_v19 }
 0x162   : > { %v758_v54 = vpop.permute.xlu0 %757 }
 0x163   : > { %v760_v25 = vadd.f32 %v758_v54, %v755_v43 }
 0x166   : > { %v816_v57 = vpop.permute.xlu1 %815 }
 0x167   : > { %v818_v28 = vadd.f32 %v816_v57, %v813_v4 }
 0x169   : > { %v823_v35 = vadd.f32 %v821_v8, %v818_v28 }
 0x16a   : > { %v709_v1 = vpop.permute.xlu0 %708  ;;  %v984_v20 = vpop.permute.xlu2 %983 }
 0x16b   : > { %v711_v23 = vadd.f32 %v709_v1, %v706_v45  ;;  %v1039_v58 = vadd.f32 %v1708_v13, %v823_v35 }
 0x16d   : > { %v927_v2 = vadd.f32 %v1704_v10, %v711_v23 }
 0x16e   : > { %v763_v9 = vpop.permute.xlu1 %762 }
 0x16f   : > { %v765_v30 = vadd.f32 %v763_v9, %v760_v25 }
 0x171   : > { %v981_v38 = vadd.f32 %v1706_v11, %v765_v30 }
 0x172   : > { %v935_v32 = vpop.permute.xlu2 %934 }
 0x173   : > { %v986_v10 = vadd.f32 %v984_v20, %v981_v38 }
 0x175   : > { %v869_v29 = vpop.permute.xlu0 %868 }
 0x176   : > { %v871_v17 = vadd.f32 %v869_v29, %v866_v15 }
 0x17d   : > { %v874_v21 = vpop.permute.xlu1 %873 }
 0x17e   : > { %v876_v22 = vadd.f32 %v874_v21, %v871_v17 }
 0x180   : > { %1051 = vst.msk [vmem:[%s136_s16] sm:$0xff] %vm1050_vm3, %v876_v22 }
 0x185   : > { %v930_v31 = vpop.permute.xlu1 %929 }
 0x186   : > { %v1042_v33 = vpop.permute.xlu0 %1041  ;;  %v932_v34 = vadd.f32 %v930_v31, %v927_v2 }
 0x187   : > { %v1044_v60 = vadd.f32 %v1042_v33, %v1039_v58 }
 0x188   : > { %v937_v37 = vadd.f32 %v935_v32, %v932_v34 }
 0x18a   : > { %1290 = vst.msk [vmem:[%s136_s16 + $0x8] sm:$0xff] %vm1050_vm3, %v937_v37 }
 0x18e   : > { %v989_v39 = vpop.permute.xlu0 %988  ;;  %v1047_v40 = vpop.permute.xlu1 %1046 }
 0x18f   : > { %v991_v41 = vadd.f32 %v989_v39, %v986_v10  ;;  %v1049_v44 = vadd.f32 %v1047_v40, %v1044_v60 }
 0x191   : > { %1291 = vst.msk [vmem:[%s136_s16 + $0x10] sm:$0xff] %vm1050_vm3, %v991_v41 }
 0x192   : > { %1292 = vst.msk [vmem:[%s136_s16 + $0x18] sm:$0xff] %vm1050_vm3, %v1049_v44 }
 0x193   : > { %1387 = shalt.err (!%p1384_p3)
}
 0x194   : > { %s1427_s5 = smov 128   ;;  %s1428_s6 = smov 8  }
 0x195   : > { %1316 = dma.vmem_to_hbm [thread:$0]  (%p1482_p5), %s1072_s23, 512, %s1074_s24, %s1059_s13, %s1427_s5, %s1427_s5, %s1428_s6  }
 0x196 PF: > { %p1322_p4 = scmp.ge.s32.totalorder %s1422_s12, 2  ;;  %s1088_s7 = sand.u32 1, %s1410_s9  }
 0x197   : > { %s1089_s8 = scalar_lea.sflag [#allocation3], %s1088_s7 }
 0x198   : > { %p1319_p7 = pnand %p1322_p4, %p1486_p6 }
 0x19a   : > { %p1320_p8 = pneg %p1319_p7 }
 0x19c   : > { %1405 = dma.done.wait (%p1320_p8), %s1089_s8, 512  }
 0x19d   : > { %1407 = vsyncadd (%p1320_p8), %s1089_s8, 4294966784  ;;  %p12_p9 = scmp.ge.s32.totalorder %s1469_s15, 4   ;;  %s1778_s9 = smov %s1414_s10 }
 0x19e   : > { %s1779_s10 = smov %s1418_s11  ;;  %s1780_s11 = smov %s1480_s18 }
 0x19f   : > { %s1781_s12 = smov %s1469_s15  ;;  %14 = sbr.rel (!%p12_p9) target bundleno = 3 (0x3), region = 84 }
 0x1a4   :  { %1095 = vsyncpa [#allocation3], 1 }
 0x1a5   :  { %1097 = vsyncpa [#allocation3 + $0x1], 1 }

</bundles_post_ra>
